<compile_context>
chip_gen: v7x
topology: tpu7x:2x2x1
jax: 0.10.0
libtpu: 0.0.40
codegen_flags: <defaults>
</compile_context>

<pallas_src>
import functools

import jax
import jax.numpy as jnp
from jax.experimental import pallas as pl
from jax.experimental.pallas import tpu as pltpu  # noqa: F401  (TPU backend)

TEMPERATURE = 0.07
POS_WEIGHTS = jnp.array([0.0, 1.0, 0.44, 0.11, 0.0, 0.0, 0.0], dtype=jnp.float32)
NEG_WEIGHTS = jnp.array([0.0, 1.0, 1.0, 1.0, 0.11, 0.44, 1.0], dtype=jnp.float32)

# Precompute log(clamp(w, 1e-9)) once at module/trace time (7-entry tables);
# packed as (7, 2): column 0 = positive weights, column 1 = negative weights.
LOG_WEIGHTS = jnp.stack(
    [jnp.log(jnp.maximum(POS_WEIGHTS, 1e-9)),
     jnp.log(jnp.maximum(NEG_WEIGHTS, 1e-9))],
    axis=1,
)


def _infonce_kernel(anchor_ref, cand_ref, logw_ref, out_ref, *, inv_temperature):
    a = anchor_ref[...].astype(jnp.float32)    # (1, D)
    c = cand_ref[...].astype(jnp.float32)      # (N, D)
    logw = logw_ref[...]                       # (N, 2) f32, already log(clamp(w))

    # Squared norms; rsqrt(max(sq, 1e-24)) == 1 / max(||x||, 1e-12), i.e. the
    # exact F.normalize(p=2) clamp, done on the EUP instead of N*D divides.
    a_sq = jnp.sum(a * a, axis=1, keepdims=True)            # (1, 1)
    c_sq = jnp.sum(c * c, axis=1, keepdims=True)            # (N, 1)
    a_inv = jax.lax.rsqrt(jnp.maximum(a_sq, 1e-24))         # (1, 1)
    c_inv = jax.lax.rsqrt(jnp.maximum(c_sq, 1e-24))         # (N, 1)

    # Similarity via VPU broadcast-multiply + lane reduce (no M=1 MXU matmul),
    # then a single fused scale by both norms and 1/temperature.
    raw = jnp.sum(c * a, axis=1, keepdims=True)             # (N, 1)
    sim = raw * (c_inv * (a_inv * inv_temperature))         # (N, 1)

    # Stacked logsumexp over the N candidates (sublane axis):
    # column 0 -> numerator (pos weights), column 1 -> denominator (neg weights).
    stacked = sim + logw                                    # (N, 2)
    m = jnp.max(stacked, axis=0, keepdims=True)             # (1, 2)
    lse = m + jnp.log(jnp.sum(jnp.exp(stacked - m), axis=0, keepdims=True))  # (1, 2)

    # loss = -(numerator - denominator) = (-1)*lse[:,0] + (+1)*lse[:,1]
    col = jax.lax.broadcasted_iota(jnp.int32, (1, 2), 1)
    sign = jnp.where(col == 0, -1.0, 1.0).astype(jnp.float32)
    out_ref[...] = jnp.sum(lse * sign, axis=1, keepdims=True)   # (1, 1)


def weighted_infonce_loss(anchor_emb, candidate_embs, levels,
                          temperature=TEMPERATURE):
    """anchor_emb: (D,), candidate_embs: (N, D), levels: (N,) int."""
    D = anchor_emb.shape[0]
    N = candidate_embs.shape[0]

    # Tiny packed log-weight gather (pure indexing glue, plain JAX): (N, 2).
    logw = jnp.take(LOG_WEIGHTS, levels.astype(jnp.int32), axis=0)
    anchor2d = anchor_emb.reshape(1, D)

    kernel = functools.partial(_infonce_kernel,
                               inv_temperature=float(1.0 / temperature))
    out = pl.pallas_call(
        kernel,
        out_shape=jax.ShapeDtypeStruct((1, 1), jnp.float32),
        in_specs=[
            pl.BlockSpec((1, D), lambda: (0, 0)),
            pl.BlockSpec((N, D), lambda: (0, 0)),
            pl.BlockSpec((N, 2), lambda: (0, 0)),
        ],
        out_specs=pl.BlockSpec((1, 1), lambda: (0, 0)),
    )(anchor2d, candidate_embs, logw)
    return out[0, 0]


def _reference_loss(anchor_emb, candidate_embs, levels, temperature=TEMPERATURE):
    a = anchor_emb / jnp.maximum(jnp.linalg.norm(anchor_emb), 1e-12)
    c = candidate_embs / jnp.maximum(
        jnp.linalg.norm(candidate_embs, axis=1, keepdims=True), 1e-12)
    sim = (a[None, :] @ c.T).squeeze(0) / temperature
    lwp = jnp.log(jnp.maximum(POS_WEIGHTS[levels], 1e-9))
    lwn = jnp.log(jnp.maximum(NEG_WEIGHTS[levels], 1e-9))
    num = jax.scipy.special.logsumexp(sim + lwp)
    den = jax.scipy.special.logsumexp(sim + lwn)
    return -(num - den)


if __name__ == "__main__":
    D = 128   # embedding dim (lane axis)
    N = 8     # number of candidates

    key = jax.random.PRNGKey(0)
    k1, k2, k3 = jax.random.split(key, 3)
    anchor_emb = jax.random.normal(k1, (D,), dtype=jnp.float32)
    candidate_embs = jax.random.normal(k2, (N, D), dtype=jnp.float32)
    levels = jax.random.randint(k3, (N,), 0, 7, dtype=jnp.int32)

    loss = weighted_infonce_loss(anchor_emb, candidate_embs, levels)
    loss = jax.block_until_ready(loss)

    ref = _reference_loss(anchor_emb, candidate_embs, levels)
    assert jnp.allclose(loss, ref, atol=1e-4, rtol=1e-4), (loss, ref)

    print("KERNEL_OK")
</pallas_src>

<mosaic_0001>
module attributes {stable_mosaic.version = 11 : i64} {
  func.func @_infonce_kernel(%arg0: memref<1x128xf32, #tpu.memory_space<vmem>>, %arg1: memref<8x128xf32, #tpu.memory_space<vmem>>, %arg2: memref<8x2xf32, #tpu.memory_space<vmem>>, %arg3: memref<1x1xf32, #tpu.memory_space<vmem>>) attributes {dimension_semantics = [], scalar_prefetch = 0 : i64, scratch_operands = 0 : i64, tpu.core_type = #tpu.core_type<tc>} {
    %c0 = arith.constant 0 : index
    %c0_0 = arith.constant 0 : index
    %0 = vector.load %arg0[%c0, %c0_0] : memref<1x128xf32, #tpu.memory_space<vmem>>, vector<1x128xf32>
    %c0_1 = arith.constant 0 : index
    %c0_2 = arith.constant 0 : index
    %1 = vector.load %arg1[%c0_1, %c0_2] : memref<8x128xf32, #tpu.memory_space<vmem>>, vector<8x128xf32>
    %c0_3 = arith.constant 0 : index
    %c0_4 = arith.constant 0 : index
    %2 = vector.load %arg2[%c0_3, %c0_4] : memref<8x2xf32, #tpu.memory_space<vmem>>, vector<8x2xf32>
    %3 = arith.mulf %0, %0 : vector<1x128xf32>
    %cst = arith.constant dense<0.000000e+00> : vector<1xf32>
    %4 = vector.multi_reduction <add>, %3, %cst [1] : vector<1x128xf32> to vector<1xf32>
    %5 = vector.shape_cast %4 : vector<1xf32> to vector<1x1xf32>
    %6 = arith.mulf %1, %1 : vector<8x128xf32>
    %cst_5 = arith.constant dense<0.000000e+00> : vector<8xf32>
    %7 = vector.multi_reduction <add>, %6, %cst_5 [1] : vector<8x128xf32> to vector<8xf32>
    %8 = vector.shape_cast %7 : vector<8xf32> to vector<8x1xf32>
    %cst_6 = arith.constant 1.000000e-24 : f32
    %9 = vector.broadcast %cst_6 : f32 to vector<1x1xf32>
    %10 = arith.maximumf %5, %9 : vector<1x1xf32>
    %11 = math.rsqrt %10 : vector<1x1xf32>
    %cst_7 = arith.constant 1.000000e-24 : f32
    %12 = vector.broadcast %cst_7 : f32 to vector<8x1xf32>
    %13 = arith.maximumf %8, %12 : vector<8x1xf32>
    %14 = math.rsqrt %13 : vector<8x1xf32>
    %15 = vector.broadcast %0 : vector<1x128xf32> to vector<8x128xf32>
    %16 = arith.mulf %1, %15 : vector<8x128xf32>
    %cst_8 = arith.constant dense<0.000000e+00> : vector<8xf32>
    %17 = vector.multi_reduction <add>, %16, %cst_8 [1] : vector<8x128xf32> to vector<8xf32>
    %18 = vector.shape_cast %17 : vector<8xf32> to vector<8x1xf32>
    %cst_9 = arith.constant 14.2857141 : f32
    %19 = vector.broadcast %cst_9 : f32 to vector<1x1xf32>
    %20 = arith.mulf %11, %19 : vector<1x1xf32>
    %21 = vector.broadcast %20 : vector<1x1xf32> to vector<8x1xf32>
    %22 = arith.mulf %14, %21 : vector<8x1xf32>
    %23 = arith.mulf %18, %22 : vector<8x1xf32>
    %24 = vector.broadcast %23 : vector<8x1xf32> to vector<8x2xf32>
    %25 = arith.addf %24, %2 : vector<8x2xf32>
    %cst_10 = arith.constant dense<0xFF800000> : vector<2xf32>
    %26 = vector.multi_reduction <maximumf>, %25, %cst_10 [0] : vector<8x2xf32> to vector<2xf32>
    %27 = vector.shape_cast %26 : vector<2xf32> to vector<1x2xf32>
    %28 = vector.broadcast %27 : vector<1x2xf32> to vector<8x2xf32>
    %29 = arith.subf %25, %28 : vector<8x2xf32>
    %30 = math.exp %29 : vector<8x2xf32>
    %cst_11 = arith.constant dense<0.000000e+00> : vector<2xf32>
    %31 = vector.multi_reduction <add>, %30, %cst_11 [0] : vector<8x2xf32> to vector<2xf32>
    %32 = vector.shape_cast %31 : vector<2xf32> to vector<1x2xf32>
    %33 = math.log %32 : vector<1x2xf32>
    %34 = arith.addf %27, %33 : vector<1x2xf32>
    %35 = tpu.iota {dimensions = array<i32: 1>} : vector<1x2xi32>
    %c0_i32 = arith.constant 0 : i32
    %36 = vector.broadcast %c0_i32 : i32 to vector<1x2xi32>
    %37 = arith.cmpi eq, %35, %36 : vector<1x2xi32>
    %cst_12 = arith.constant -1.000000e+00 : f32
    %cst_13 = arith.constant 1.000000e+00 : f32
    %38 = vector.broadcast %cst_12 : f32 to vector<1x2xf32>
    %39 = vector.broadcast %cst_13 : f32 to vector<1x2xf32>
    %40 = arith.select %37, %38, %39 : vector<1x2xi1>, vector<1x2xf32>
    %41 = arith.mulf %34, %40 : vector<1x2xf32>
    %cst_14 = arith.constant dense<0.000000e+00> : vector<1xf32>
    %42 = vector.multi_reduction <add>, %41, %cst_14 [1] : vector<1x2xf32> to vector<1xf32>
    %43 = vector.shape_cast %42 : vector<1xf32> to vector<1x1xf32>
    %c0_15 = arith.constant 0 : index
    %c0_16 = arith.constant 0 : index
    %44 = vector.load %arg3[%c0_15, %c0_16] : memref<1x1xf32, #tpu.memory_space<vmem>>, vector<1x1xf32>
    tpu.vector_store %arg3[%c0_15, %c0_16], %43 {strides = array<i32>} : memref<1x1xf32, #tpu.memory_space<vmem>>, vector<1x1xf32>,
    return
  }
}

</mosaic_0001>

<bundles_post_ra>
// kernel: tpu_custom_call.1
= control target key start
LH: loop header
LB: loop body
LE: loop exit
PB: predicated region body
PF: predicated region fallthrough
CT: control target
= control target key end

     0   :  { %vm19_vm0 = vcmask 1040384   ;;  %v31_v1 = vlaneseq  ;;  %s172_s0 = inlined_call_operand.vmem [shape: f32[1,128], index: 0, kind: input, shape index: {}]   ;;  %s173_s1 = inlined_call_operand.vmem [shape: f32[8,128], index: 1, kind: input, shape index: {}]   ;;  %s174_s2 = inlined_call_operand.vmem [shape: f32[8,2], index: 2, kind: input, shape index: {}]   ;;  %s175_s3 = inlined_call_operand.hbm [shape: f32[1,1], index: 3, kind: output, shape index: {}]  }
   0x1   :  { %v15_v0 = vld [vmem:[%s172_s0] sm:$0x1] }
   0x2   :  { %8 = vsyncpa [#allocation3], 0  ;;  %v18_v2 = vmul.f32 %v15_v0, %v15_v0  ;;  %v16_v3 = vld [vmem:[%s173_s1] sm:$0xff]  ;;  %v32_v4 = vshrl.u32 %v31_v1, 7  ;;  %vm47_vm1 = vcmask 15360   ;;  %v69_v40 = vand.u32 127, %v31_v1 }
   0x3   :  { %v23_v6 = vmul.f32 %v16_v3, %v16_v3  ;;  %v17_v20 = vld [vmem:[%s174_s2] sm:$0xff]  ;;  %v126_v43 = vmov 1.0   ;;  %s127_s2 = smov [#allocation2]   ;;  %vm76_vm3 = vcmask 0  }
   0x4   :  { %v20_v5 = vsel %vm19_vm0, %v18_v2, 0.0  ;;  %v33_v7 = vsub.s32 0, %v32_v4  ;;  %vm70_vm2 = vcmp.eq.s32.totalorder %v69_v40, 0  ;;  %s84_s16 = sshll.u32 %s127_s2, 4  ;;  %s85_s16 = int_to_ptr.vmem [resolvable:$true] %s84_s16 }
   0x5   :  { %21 = vadd.xlane.f32.xlu0 %v20_v5  ;;  %v71_v44 = vsel %vm70_vm2, -1.0, %v126_v43  ;;  %s102_s17 = scalar_lea.vmem %s85_s16, 16  ;;  %s106_s18 = scalar_lea.vmem %s85_s16, 32 }
   0x6   :  { %v34_v8 = vrot.slane %v15_v0, %v33_v7  ;;  %p103_p0 = scmp.ne.s32.totalorder %s85_s16, %s102_s17  ;;  %p107_p1 = scmp.lt.s32.totalorder %s85_s16, %s85_s16 }
   0x7   :  { %p108_p2 = scmp.lt.s32.totalorder %s106_s18, %s102_s17 }
   0x8   :  { %v36_v9 = vmul.f32 %v34_v8, %v16_v3 }
   0x9   :  { %24 = vadd.xlane.f32.xlu0 %v23_v6  ;;  %p109_p3 = por %p108_p2, %p107_p1 }
   0xa   :  { %37 = vadd.xlane.f32.xlu1 %v36_v9 }
   0xb   :  { %p110_p4 = pnand %p109_p3, %p103_p0 }
  0x92   :  { %v22_v10 = vpop.xlane.xlu0 %21 }
  0x93   :  { %v26_v11 = vmax.f32 %v22_v10, 1e-24 }
  0x95   :  { %94 = vrsqrt.f32 %v26_v11 }
  0x96   :  { %v25_v12 = vpop.xlane.xlu0 %24 }
  0x97   :  { %v28_v13 = vmax.f32 %v25_v12, 1e-24  ;;  %v38_v18 = vpop.xlane.xlu1 %37 }
  0x99   :  { %96 = vrsqrt.f32 %v28_v13 }
  0x9f   :  { %v95_v14 = vpop.eup %94 }
  0xa0   :  { %v39_v15 = vmul.f32 14.285714, %v95_v14 }
  0xa2   :  { %v43_v16 = vrot.slane %v39_v15, %v33_v7 }
  0xa3   :  { %v97_v17 = vpop.eup %96 }
  0xa4   :  { %v44_v19 = vmul.f32 %v97_v17, %v43_v16 }
  0xa6   :  { %v45_v21 = vmul.f32 %v44_v19, %v38_v18 }
  0xa8   :  { %v46_v22 = vadd.f32 %v45_v21, %v17_v20 }
  0xaa   :  { %v48_v23 = vsel %vm47_vm1, %v46_v22, -inf }
  0xab   :  { %v49_v24 = vrot.slane %v48_v23, 4 }
  0xad   :  { %v50_v25 = vmax.f32 %v48_v23, %v49_v24 }
  0xaf   :  { %v51_v26 = vrot.slane %v50_v25, 2 }
  0xb1   :  { %v52_v27 = vmax.f32 %v50_v25, %v51_v26 }
  0xb3   :  { %v53_v28 = vrot.slane %v52_v27, 1 }
  0xb5   :  { %v54_v29 = vmax.f32 %v52_v27, %v53_v28 }
  0xb7   :  { %v55_v30 = vsub.f32 %v46_v22, %v54_v29 }
  0xb9   :  { %v56_v31 = vmul.f32 1.442695, %v55_v30 }
  0xbb   :  { %98 = vpow2.f32 %v56_v31 }
  0xc5   :  { %v99_v32 = vpop.eup %98 }
  0xc6   :  { %v58_v33 = vsel %vm47_vm1, %v99_v32, 0.0 }
  0xc7   :  { %v59_v34 = vrot.slane %v58_v33, 4 }
  0xc9   :  { %v60_v35 = vadd.f32 %v59_v34, %v58_v33 }
  0xcb   :  { %v61_v36 = vrot.slane %v60_v35, 2 }
  0xcd   :  { %v62_v37 = vadd.f32 %v61_v36, %v60_v35 }
  0xcf   :  { %v63_v38 = vrot.slane %v62_v37, 1 }
  0xd1   :  { %v64_v39 = vadd.f32 %v63_v38, %v62_v37 }
  0xd3   :  { %100 = vlog2.f32 %v64_v39 }
  0xdd   :  { %v101_v41 = vpop.eup %100 }
  0xde   :  { %v66_v42 = vmul.f32 0.6931472, %v101_v41 }
  0xe0   :  { %v67_v45 = vadd.f32 %v66_v42, %v54_v29 }
  0xe2   :  { %v72_v46 = vmul.f32 %v71_v44, %v67_v45 }
  0xe4   :  { %v73_v47 = vsel %vm47_vm1, %v72_v46, 0.0 }
  0xe5   :  { %74 = vadd.xlane.f32.xlu1 %v73_v47 }
 0x172   :  { %v75_v48 = vpop.xlane.xlu1 %74 }
 0x173   :  { %77 = vst.msk [vmem:[#allocation2] sm:$0x1] %vm76_vm3, %v75_v48 }
 0x174   :  { %113 = shalt.err (!%p110_p4)
}
 0x175   :  { %s114_s21 = scalar_lea.hbm %s175_s3, 16 }
 0x176   :  { %p115_p5 = scmp.ne.s32.totalorder %s175_s3, %s114_s21  ;;  %p118_p6 = scmp.lt.u32.totalorder %s114_s21, %s175_s3 }
 0x178   :  { %p120_p7 = pnand %p118_p6, %p115_p5 }
 0x17a   :  { %123 = shalt.err (!%p120_p7)
}
 0x17b   :  { %87 = dma.vmem_to_hbm [thread:$0]  %s85_s16, 16, %s175_s3, [#allocation3]  }
 0x17c   :  { %124 = dma.done.wait [#allocation3], 16  }
 0x17d   :  { %125 = vsyncadd [#allocation3], 4294967280 }
 0x17e   :  { %91 = vsyncpa [#allocation3], 1 }

</bundles_post_ra>
